<compile_context>
chip_gen: v6e
topology: v6e:2x2x1
jax: 0.10.0
libtpu: 0.0.40
codegen_flags: <defaults>
</compile_context>

<pallas_src>
import jax
import jax.numpy as jnp
from jax.experimental import pallas as pl
from jax.experimental.pallas import tpu as pltpu


# ---------------------------------------------------------------------------
# Kernel
# ---------------------------------------------------------------------------
def mlp_kernel(x_ref, w1_ref, b1_ref, w2_ref, b2_ref, o_ref):
    # fc1: (TB, Dp) @ (Dp, Hp) -> f32 accumulate on the MXU.
    h = jnp.dot(x_ref[...], w1_ref[...], preferred_element_type=jnp.float32)
    # bias + ReLU in f32 on the VPU (keeps v5e off any bf16-emulation path).
    h = jnp.maximum(h + b1_ref[...], 0.0)
    # fc2: (TB, Hp) @ (Hp, Cp); match RHS dtype so bf16 mode feeds the MXU bf16.
    out = jnp.dot(h.astype(w2_ref.dtype), w2_ref[...],
                  preferred_element_type=jnp.float32)
    o_ref[...] = (out + b2_ref[...]).astype(o_ref.dtype)


# ---------------------------------------------------------------------------
# Helpers
# ---------------------------------------------------------------------------
def _round_up(x, m):
    return (x + m - 1) // m * m


def _cdiv(a, b):
    return -(-a // b)


def _sublane(dtype):
    # f32 -> 8, bf16 -> 16, int8/fp8 -> 32 (sub-32-bit dtypes pack along sublanes).
    return {1: 32, 2: 16, 4: 8}.get(jnp.dtype(dtype).itemsize, 8)


def _default_vmem_limit_bytes():
    """~3/4 of physical VMEM (96 MiB on v5e/v6e, 48 MiB on v7x); safe fallback."""
    try:
        cap = getattr(pltpu.get_tpu_info(), "vmem_capacity_bytes", None)
    except Exception:
        cap = None
    if not cap:
        cap = 64 * 1024 * 1024
    return (int(cap) * 3) // 4


def prepare_params(w1, b1, w2, b2, *, mxu_dtype=jnp.bfloat16):
    """Pad weights/biases to lane-dense 128-multiples and cast ONCE (hoisted
    out of the per-call path).  Zero padding preserves semantics: padded
    hidden columns are 0 after ReLU, padded w2 rows/cols and bias columns are
    0, so padded outputs are exactly 0."""
    D, H = w1.shape
    C = w2.shape[1]
    D_pad, H_pad, C_pad = (_round_up(d, 128) for d in (D, H, C))
    return {
        "w1": jnp.pad(w1, ((0, D_pad - D), (0, H_pad - H))).astype(mxu_dtype),
        "b1": jnp.pad(b1.reshape(1, H), ((0, 0), (0, H_pad - H))).astype(jnp.float32),
        "w2": jnp.pad(w2, ((0, H_pad - H), (0, C_pad - C))).astype(mxu_dtype),
        "b2": jnp.pad(b2.reshape(1, C), ((0, 0), (0, C_pad - C))).astype(jnp.float32),
        "dims": (D, H, C),
    }


def _pick_tile_b(B, max_tile_b, sublane):
    # Smallest tile count that respects max_tile_b, spread evenly (minimises
    # B_pad waste), rounded to the dtype's sublane multiple.  Prefer >=2 tiles
    # when the batch supports it so ("parallel",) engages both v7x TCs.
    n_tiles = max(1, _cdiv(B, max_tile_b))
    if n_tiles == 1 and B >= 2 * sublane:
        n_tiles = 2
    return _round_up(_cdiv(B, n_tiles), sublane)


def _shrink_to_fit(tile_b, D_pad, H_pad, C_pad, in_bytes, out_bytes,
                   vmem_limit_bytes, sublane):
    # Resident weights/biases still get two pipeline buffers each; x/out tiles
    # are double-buffered; the f32 intermediate lives in vregs/VMEM.
    fixed = 2 * (D_pad * H_pad + H_pad * C_pad) * in_bytes + 2 * (H_pad + C_pad) * 4
    while tile_b > sublane:
        per_tile = (2 * tile_b * D_pad * in_bytes       # x (double-buffered)
                    + 2 * tile_b * C_pad * out_bytes    # out (double-buffered)
                    + tile_b * H_pad * 4                # f32 intermediate h
                    + tile_b * C_pad * 4)               # f32 pre-cast output
        if fixed + per_tile <= int(vmem_limit_bytes * 0.8):
            break
        tile_b //= 2
    return max(_round_up(tile_b, sublane), sublane)


# ---------------------------------------------------------------------------
# Forward
# ---------------------------------------------------------------------------
def neural_net_forward(x, params, *, max_tile_b=None, out_dtype=jnp.float32,
                       slice_output=True, vmem_limit_bytes=None):
    """x:(B,D) -> (B,C); set slice_output=False to keep the padded lane-dense
    (B_pad, C_pad) buffer (avoids the trailing HBM slice copy downstream)."""
    w1p, b1p, w2p, b2p = params["w1"], params["b1"], params["w2"], params["b2"]
    D, H, C = params["dims"]
    D_pad, H_pad = w1p.shape
    C_pad = w2p.shape[1]
    mxu_dtype = w1p.dtype
    in_bytes = jnp.dtype(mxu_dtype).itemsize
    out_bytes = jnp.dtype(out_dtype).itemsize
    sublane = _sublane(mxu_dtype)

    B = x.shape[0]
    assert x.shape[1] == D, f"expected input_size={D}, got {x.shape[1]}"

    if vmem_limit_bytes is None:
        vmem_limit_bytes = _default_vmem_limit_bytes()
    if max_tile_b is None:
        max_tile_b = 2048 if vmem_limit_bytes >= 80 * 1024 * 1024 else 1024
    # TODO(synk): add a K/H-tiled accumulator path (grid k axis, f32 VMEM
    # scratch, @pl.when init/flush) for layers where D_pad*H_pad does not fit
    # the VMEM budget; the current path keeps both weight matrices resident.
    max_tile_b = _shrink_to_fit(max_tile_b, D_pad, H_pad, C_pad, in_bytes,
                                out_bytes, vmem_limit_bytes, sublane)

    tile_b = _pick_tile_b(B, max_tile_b, sublane)
    B_pad = _round_up(B, tile_b)
    grid = (B_pad // tile_b,)

    # Per-call input prep touches only x: pad batch/K and cast to the MXU
    # dtype (a single fused XLA op; skipped entirely when nothing changes).
    if (B_pad != B) or (D_pad != D) or (x.dtype != mxu_dtype):
        xp = jnp.pad(x, ((0, B_pad - B), (0, D_pad - D))).astype(mxu_dtype)
    else:
        xp = x

    cost = pl.CostEstimate(
        flops=2 * B_pad * (D_pad * H_pad + H_pad * C_pad),
        transcendentals=0,
        bytes_accessed=(xp.size * in_bytes
                        + (w1p.size + w2p.size) * in_bytes
                        + (b1p.size + b2p.size) * 4
                        + B_pad * C_pad * out_bytes),
    )

    out = pl.pallas_call(
        mlp_kernel,
        out_shape=jax.ShapeDtypeStruct((B_pad, C_pad), out_dtype),
        grid=grid,
        in_specs=[
            # batch-tiled, lane-dense activations
            pl.BlockSpec((tile_b, D_pad), lambda i: (i, 0)),
            # weights / biases: constant index_map -> fetched once and kept
            # VMEM-resident across all batch tiles
            pl.BlockSpec((D_pad, H_pad), lambda i: (0, 0)),
            pl.BlockSpec((1, H_pad), lambda i: (0, 0)),
            pl.BlockSpec((H_pad, C_pad), lambda i: (0, 0)),
            pl.BlockSpec((1, C_pad), lambda i: (0, 0)),
        ],
        out_specs=pl.BlockSpec((tile_b, C_pad), lambda i: (i, 0)),
        compiler_params=pltpu.CompilerParams(
            dimension_semantics=("parallel",),   # batch tiles are independent
            vmem_limit_bytes=int(vmem_limit_bytes),
        ),
        cost_estimate=cost,
    )(xp, w1p, b1p, w2p, b2p)

    if slice_output:
        return out[:B, :C]
    return out


def init_params(key, input_size, hidden_size, num_classes):
    # Deterministic init mimicking nn.Linear's uniform(-1/sqrt(fan_in), 1/sqrt(fan_in)).
    k1, k2, k3, k4 = jax.random.split(key, 4)
    lim1 = 1.0 / jnp.sqrt(jnp.float32(input_size))
    lim2 = 1.0 / jnp.sqrt(jnp.float32(hidden_size))
    w1 = jax.random.uniform(k1, (input_size, hidden_size), jnp.float32, -lim1, lim1)
    b1 = jax.random.uniform(k2, (1, hidden_size), jnp.float32, -lim1, lim1)
    w2 = jax.random.uniform(k3, (hidden_size, num_classes), jnp.float32, -lim2, lim2)
    b2 = jax.random.uniform(k4, (1, num_classes), jnp.float32, -lim2, lim2)
    return w1, b1, w2, b2


if __name__ == "__main__":
    input_size, hidden_size, num_classes = 64, 32, 16
    batch = 8

    key = jax.random.PRNGKey(0)
    kx, kp = jax.random.split(key)
    x = jax.random.normal(kx, (batch, input_size), jnp.float32)
    w1, b1, w2, b2 = init_params(kp, input_size, hidden_size, num_classes)

    # Plain-JAX reference of the PyTorch forward.
    ref = jnp.maximum(x @ w1 + b1, 0.0) @ w2 + b2

    # f32 MXU path: strict tolerance self-check.
    params_f32 = prepare_params(w1, b1, w2, b2, mxu_dtype=jnp.float32)
    out_f32 = jax.block_until_ready(neural_net_forward(x, params_f32))
    assert out_f32.shape == (batch, num_classes)
    assert jnp.allclose(out_f32, ref, atol=1e-5, rtol=1e-5)

    # bf16 MXU path (default inference mode): bf16 operands, f32 accumulate,
    # so the tolerance is gated to bf16 precision (~3 decimal digits).
    params_bf16 = prepare_params(w1, b1, w2, b2)   # mxu_dtype defaults to bf16
    out_bf16 = jax.block_until_ready(neural_net_forward(x, params_bf16))
    assert out_bf16.shape == (batch, num_classes)
    assert jnp.allclose(out_bf16, ref, atol=5e-2, rtol=5e-2)

    print("KERNEL_OK")
</pallas_src>

<mosaic_0001>
module attributes {stable_mosaic.version = 11 : i64} {
  func.func @mlp_kernel(%arg0: i32, %arg1: memref<8x128xf32, #tpu.memory_space<vmem>>, %arg2: memref<128x128xf32, #tpu.memory_space<vmem>>, %arg3: memref<1x128xf32, #tpu.memory_space<vmem>>, %arg4: memref<128x128xf32, #tpu.memory_space<vmem>>, %arg5: memref<1x128xf32, #tpu.memory_space<vmem>>, %arg6: memref<8x128xf32, #tpu.memory_space<vmem>>) attributes {dimension_semantics = [#tpu.dimension_semantics<parallel>], iteration_bounds = array<i64: 1>, scalar_prefetch = 0 : i64, scratch_operands = 0 : i64, tpu.core_type = #tpu.core_type<tc>, window_params = [{transform_indices = @transform_0, window_bounds = array<i64: 8, 128>}, {pipeline_mode = #tpu.pipeline_mode<synchronous>, transform_indices = @transform_1, window_bounds = array<i64: 128, 128>}, {pipeline_mode = #tpu.pipeline_mode<synchronous>, transform_indices = @transform_2, window_bounds = array<i64: 1, 128>}, {pipeline_mode = #tpu.pipeline_mode<synchronous>, transform_indices = @transform_3, window_bounds = array<i64: 128, 128>}, {pipeline_mode = #tpu.pipeline_mode<synchronous>, transform_indices = @transform_4, window_bounds = array<i64: 1, 128>}, {transform_indices = @transform_5, window_bounds = array<i64: 8, 128>}]} {
    %c0 = arith.constant 0 : index
    %c0_0 = arith.constant 0 : index
    %0 = vector.load %arg1[%c0, %c0_0] : memref<8x128xf32, #tpu.memory_space<vmem>>, vector<8x128xf32>
    %c0_1 = arith.constant 0 : index
    %c0_2 = arith.constant 0 : index
    %1 = vector.load %arg2[%c0_1, %c0_2] : memref<128x128xf32, #tpu.memory_space<vmem>>, vector<128x128xf32>
    %cst = arith.constant dense<0.000000e+00> : vector<8x128xf32>
    %2 = tpu.matmul %0, %1, %cst {dimension_numbers = #tpu.dot_dimension_numbers<[1], [0], [0], [1], [0, 0, 1, 1], [], []>} : vector<8x128xf32>, vector<128x128xf32>, vector<8x128xf32> -> vector<8x128xf32>
    %c0_3 = arith.constant 0 : index
    %c0_4 = arith.constant 0 : index
    %3 = vector.load %arg3[%c0_3, %c0_4] : memref<1x128xf32, #tpu.memory_space<vmem>>, vector<1x128xf32>
    %4 = vector.broadcast %3 : vector<1x128xf32> to vector<8x128xf32>
    %5 = arith.addf %2, %4 : vector<8x128xf32>
    %cst_5 = arith.constant 0.000000e+00 : f32
    %6 = vector.broadcast %cst_5 : f32 to vector<8x128xf32>
    %7 = arith.maximumf %5, %6 : vector<8x128xf32>
    %c0_6 = arith.constant 0 : index
    %c0_7 = arith.constant 0 : index
    %8 = vector.load %arg4[%c0_6, %c0_7] : memref<128x128xf32, #tpu.memory_space<vmem>>, vector<128x128xf32>
    %cst_8 = arith.constant dense<0.000000e+00> : vector<8x128xf32>
    %9 = tpu.matmul %7, %8, %cst_8 {dimension_numbers = #tpu.dot_dimension_numbers<[1], [0], [0], [1], [0, 0, 1, 1], [], []>} : vector<8x128xf32>, vector<128x128xf32>, vector<8x128xf32> -> vector<8x128xf32>
    %c0_9 = arith.constant 0 : index
    %c0_10 = arith.constant 0 : index
    %10 = vector.load %arg5[%c0_9, %c0_10] : memref<1x128xf32, #tpu.memory_space<vmem>>, vector<1x128xf32>
    %11 = vector.broadcast %10 : vector<1x128xf32> to vector<8x128xf32>
    %12 = arith.addf %9, %11 : vector<8x128xf32>
    %c0_11 = arith.constant 0 : index
    %c0_12 = arith.constant 0 : index
    %13 = vector.load %arg6[%c0_11, %c0_12] : memref<8x128xf32, #tpu.memory_space<vmem>>, vector<8x128xf32>
    tpu.vector_store %arg6[%c0_11, %c0_12], %12 {strides = array<i32>} : memref<8x128xf32, #tpu.memory_space<vmem>>, vector<8x128xf32>,
    return
  }
  func.func @transform_0(%arg0: i32) -> (i32, i32) {
    %c0_i32 = arith.constant 0 : i32
    %c0_i32_0 = arith.constant 0 : i32
    return %arg0, %c0_i32 : i32, i32
  }
  func.func @transform_1(%arg0: i32) -> (i32, i32) {
    %c0_i32 = arith.constant 0 : i32
    %c0_i32_0 = arith.constant 0 : i32
    %c0_i32_1 = arith.constant 0 : i32
    return %c0_i32, %c0_i32_0 : i32, i32
  }
  func.func @transform_2(%arg0: i32) -> (i32, i32) {
    %c0_i32 = arith.constant 0 : i32
    %c0_i32_0 = arith.constant 0 : i32
    %c0_i32_1 = arith.constant 0 : i32
    return %c0_i32, %c0_i32_0 : i32, i32
  }
  func.func @transform_3(%arg0: i32) -> (i32, i32) {
    %c0_i32 = arith.constant 0 : i32
    %c0_i32_0 = arith.constant 0 : i32
    %c0_i32_1 = arith.constant 0 : i32
    return %c0_i32, %c0_i32_0 : i32, i32
  }
  func.func @transform_4(%arg0: i32) -> (i32, i32) {
    %c0_i32 = arith.constant 0 : i32
    %c0_i32_0 = arith.constant 0 : i32
    %c0_i32_1 = arith.constant 0 : i32
    return %c0_i32, %c0_i32_0 : i32, i32
  }
  func.func @transform_5(%arg0: i32) -> (i32, i32) {
    %c0_i32 = arith.constant 0 : i32
    %c0_i32_0 = arith.constant 0 : i32
    return %arg0, %c0_i32 : i32, i32
  }
}

</mosaic_0001>

<bundles_post_ra>
// kernel: tpu_custom_call.1
= control target key start
LH: loop header
LB: loop body
LE: loop exit
PB: predicated region body
PF: predicated region fallthrough
CT: control target
= control target key end

     0   :  { %10 = vsyncpa [#allocation3], 0  ;;  %s555_s0 = inlined_call_operand.hbm [shape: f32[8,128], index: 0, kind: input, shape index: {}]   ;;  %s556_s1 = inlined_call_operand.hbm [shape: f32[128,128], index: 1, kind: input, shape index: {}]   ;;  %s557_s2 = inlined_call_operand.vmem [shape: f32[1,128], index: 2, kind: input, shape index: {}]   ;;  %s558_s3 = inlined_call_operand.hbm [shape: f32[128,128], index: 3, kind: input, shape index: {}]   ;;  %s559_s4 = inlined_call_operand.vmem [shape: f32[1,128], index: 4, kind: input, shape index: {}]   ;;  %s560_s5 = inlined_call_operand.hbm [shape: f32[8,128], index: 5, kind: output, shape index: {}]  }
   0x1   :  { %11 = vsyncpa [#allocation6], 0 }
   0x2   :  { %12 = vsyncpa [#allocation4], 0  ;;  %s465_s18 = smov [#allocation5]  }
   0x3   :  { %s28_s19 = sshll.u32 %s465_s18, 4  ;;  %s29_s19 = int_to_ptr.vmem [resolvable:$true] %s28_s19 }
   0x4   :  { %s387_s20 = scalar_lea.vmem %s29_s19, 2048  ;;  %p392_p1 = scmp.lt.s32.totalorder %s29_s19, %s29_s19 }
   0x5   :  { %p388_p0 = scmp.ne.s32.totalorder %s29_s19, %s387_s20  ;;  %p393_p2 = scmp.lt.s32.totalorder %s387_s20, %s387_s20 }
   0x7   :  { %p394_p3 = por %p393_p2, %p392_p1 }
   0x9   :  { %p395_p4 = pnand %p394_p3, %p388_p0 }
   0xb   :  { %398 = shalt.err (!%p395_p4)
}
   0xc   :  { %s466_s21 = smov 128   ;;  %s467_s22 = smov 8  }
   0xd   :  { %34 = dma.hbm_to_vmem [thread:$0]  %s556_s1, 2048, %s29_s19, [#allocation6], %s466_s21, %s466_s21, %s467_s22  }
   0xe   :  { %s468_s25 = smov [#allocation2]   ;;  %s469_s27 = smov [#allocation7]  }
   0xf   :  { %s19_s26 = sshll.u32 %s468_s25, 4  ;;  %s42_s28 = sshll.u32 %s469_s27, 4  ;;  %s20_s26 = int_to_ptr.vmem [resolvable:$true] %s19_s26  ;;  %s43_s28 = int_to_ptr.vmem [resolvable:$true] %s42_s28 }
  0x10   :  { %s407_s29 = scalar_lea.vmem %s20_s26, 128  ;;  %p412_p6 = scmp.lt.s32.totalorder %s20_s26, %s20_s26 }
  0x11   :  { %p408_p5 = scmp.ne.s32.totalorder %s20_s26, %s407_s29  ;;  %p413_p7 = scmp.lt.s32.totalorder %s407_s29, %s407_s29 }
  0x13   :  { %p414_p8 = por %p413_p7, %p412_p6 }
  0x15   :  { %p415_p9 = pnand %p414_p8, %p408_p5 }
  0x17   :  { %418 = shalt.err (!%p415_p9)
}
  0x18   :  { %22 = dma.hbm_to_vmem [thread:$0]  %s555_s0, 128, %s20_s26, [#allocation3]  }
  0x19   :  { %s427_s7 = scalar_lea.vmem %s43_s28, 2048  ;;  %p432_p11 = scmp.lt.s32.totalorder %s43_s28, %s43_s28 }
  0x1a   :  { %p428_p10 = scmp.ne.s32.totalorder %s43_s28, %s427_s7  ;;  %p433_p12 = scmp.lt.s32.totalorder %s427_s7, %s427_s7 }
  0x1c   :  { %p434_p13 = por %p433_p12, %p432_p11 }
  0x1e   :  { %p435_p0 = pnand %p434_p13, %p428_p10 }
  0x20   :  { %438 = shalt.err (!%p435_p0)
}
  0x21   :  { %48 = dma.hbm_to_vmem [thread:$0]  %s558_s3, 2048, %s43_s28, [#allocation6], %s466_s21, %s466_s21, %s467_s22  }
  0x22   :  { %459 = dma.done.wait [#allocation3], 128  }
  0x23   :  { %460 = vsyncadd [#allocation3], 4294967168 }
  0x24   :  { %461 = dma.done.wait [#allocation6], 4096  }
  0x25   :  { %462 = vsyncadd [#allocation6], 4294963200  ;;  %v470_v0 = vmov 0.0   ;;  %vm471_vm0 = vmmov 0   ;;  %v76_v1 = vld [vmem:[#allocation5 + $0x78] sm:$0xff]  ;;  %v75_v2 = vld [vmem:[#allocation5 + $0x70] sm:$0xff] }
  0x26   :  { %301 = vmatprep.subr.mxu0 %v470_v0  ;;  %333 = vmatprep.mubr.msk.f32.mxu0 %vm471_vm0, %v470_v0  ;;  %v74_v3 = vld [vmem:[#allocation5 + $0x68] sm:$0xff]  ;;  %v73_v4 = vld [vmem:[#allocation5 + $0x60] sm:$0xff]  ;;  %v170_v5 = vld [vmem:[#allocation7 + $0x78] sm:$0xff]  ;;  %s472_s11 = smov [#allocation8]  }
  0x27   :  { %336 = vmatprep.subr.mxu1 %v470_v0  ;;  %368 = vmatprep.mubr.msk.f32.mxu1 %vm471_vm0, %v470_v0  ;;  %v72_v6 = vld [vmem:[#allocation5 + $0x58] sm:$0xff]  ;;  %v169_v7 = vld [vmem:[#allocation7 + $0x70] sm:$0xff]  ;;  %v168_v8 = vld [vmem:[#allocation7 + $0x68] sm:$0xff]  ;;  %s255_s12 = sshll.u32 %s472_s11, 4  ;;  %s256_s12 = int_to_ptr.vmem [resolvable:$true] %s255_s12 }
  0x28   :  { %302 = vmatpush3.msra.mxu0 %v76_v1  ;;  %337 = vmatpush3.msra.mxu1 %v170_v5  ;;  %v71_v9 = vld [vmem:[#allocation5 + $0x50] sm:$0xff]  ;;  %v167_v10 = vld [vmem:[#allocation7 + $0x60] sm:$0xff]  ;;  %v70_v11 = vld [vmem:[#allocation5 + $0x48] sm:$0xff]  ;;  %s439_s13 = scalar_lea.vmem %s256_s12, 128  ;;  %p444_p2 = scmp.lt.s32.totalorder %s256_s12, %s256_s12 }
  0x29   :  { %303 = vmatprep.subr.mxu0 %v470_v0  ;;  %338 = vmatprep.subr.mxu1 %v470_v0  ;;  %v166_v12 = vld [vmem:[#allocation7 + $0x58] sm:$0xff]  ;;  %v69_v13 = vld [vmem:[#allocation5 + $0x40] sm:$0xff]  ;;  %v165_v14 = vld [vmem:[#allocation7 + $0x50] sm:$0xff]  ;;  %p440_p1 = scmp.ne.s32.totalorder %s256_s12, %s439_s13  ;;  %p445_p3 = scmp.lt.s32.totalorder %s439_s13, %s439_s13 }
  0x2a   :  { %304 = vmatpush3.msra.mxu0 %v75_v2  ;;  %339 = vmatpush3.msra.mxu1 %v169_v7  ;;  %v68_v15 = vld [vmem:[#allocation5 + $0x38] sm:$0xff]  ;;  %v164_v16 = vld [vmem:[#allocation7 + $0x48] sm:$0xff]  ;;  %v67_v17 = vld [vmem:[#allocation5 + $0x30] sm:$0xff] }
  0x2b   :  { %305 = vmatprep.subr.mxu0 %v470_v0  ;;  %340 = vmatprep.subr.mxu1 %v470_v0  ;;  %v163_v18 = vld [vmem:[#allocation7 + $0x40] sm:$0xff]  ;;  %v66_v19 = vld [vmem:[#allocation5 + $0x28] sm:$0xff]  ;;  %v162_v20 = vld [vmem:[#allocation7 + $0x38] sm:$0xff]  ;;  %p446_p4 = por %p445_p3, %p444_p2 }
  0x2c   :  { %306 = vmatpush3.msra.mxu0 %v74_v3  ;;  %341 = vmatpush3.msra.mxu1 %v168_v8  ;;  %v65_v21 = vld [vmem:[#allocation5 + $0x20] sm:$0xff]  ;;  %v161_v22 = vld [vmem:[#allocation7 + $0x30] sm:$0xff]  ;;  %v64_v23 = vld [vmem:[#allocation5 + $0x18] sm:$0xff] }
  0x2d   :  { %307 = vmatprep.subr.mxu0 %v470_v0  ;;  %342 = vmatprep.subr.mxu1 %v470_v0  ;;  %v160_v24 = vld [vmem:[#allocation7 + $0x28] sm:$0xff]  ;;  %v63_v25 = vld [vmem:[#allocation5 + $0x10] sm:$0xff]  ;;  %v159_v26 = vld [vmem:[#allocation7 + $0x20] sm:$0xff]  ;;  %p447_p5 = pnand %p446_p4, %p440_p1 }
  0x2e   :  { %308 = vmatpush3.msra.mxu0 %v73_v4  ;;  %343 = vmatpush3.msra.mxu1 %v167_v10  ;;  %v62_v27 = vld [vmem:[#allocation5 + $0x8] sm:$0xff]  ;;  %v158_v28 = vld [vmem:[#allocation7 + $0x18] sm:$0xff]  ;;  %v61_v29 = vld [vmem:[#allocation5] sm:$0xff] }
  0x2f   :  { %309 = vmatprep.subr.mxu0 %v470_v0  ;;  %344 = vmatprep.subr.mxu1 %v470_v0  ;;  %v60_v30 = vld [vmem:[#allocation2] sm:$0xff]  ;;  %v157_v31 = vld [vmem:[#allocation7 + $0x10] sm:$0xff]  ;;  %v156_v32 = vld [vmem:[#allocation7 + $0x8] sm:$0xff] }
  0x30   :  { %310 = vmatpush3.msra.mxu0 %v72_v6  ;;  %345 = vmatpush3.msra.mxu1 %v166_v12  ;;  %v155_v33 = vld [vmem:[#allocation7] sm:$0xff]  ;;  %v265_v34 = vld [vmem:[%s557_s2] ss:$0 sm:$0xff] }
  0x31   :  { %311 = vmatprep.subr.mxu0 %v470_v0  ;;  %346 = vmatprep.subr.mxu1 %v470_v0  ;;  %v266_v39 = vld [vmem:[%s559_s4] ss:$0 sm:$0xff] }
  0x32   :  { %312 = vmatpush3.msra.mxu0 %v71_v9  ;;  %347 = vmatpush3.msra.mxu1 %v165_v14 }
  0x33   :  { %313 = vmatprep.subr.mxu0 %v470_v0  ;;  %348 = vmatprep.subr.mxu1 %v470_v0 }
  0x34   :  { %314 = vmatpush3.msra.mxu0 %v70_v11  ;;  %349 = vmatpush3.msra.mxu1 %v164_v16 }
  0x35   :  { %315 = vmatprep.subr.mxu0 %v470_v0  ;;  %350 = vmatprep.subr.mxu1 %v470_v0 }
  0x36   :  { %316 = vmatpush3.msra.mxu0 %v69_v13  ;;  %351 = vmatpush3.msra.mxu1 %v163_v18 }
  0x37   :  { %317 = vmatprep.subr.mxu0 %v470_v0  ;;  %352 = vmatprep.subr.mxu1 %v470_v0 }
  0x38   :  { %318 = vmatpush3.msra.mxu0 %v68_v15  ;;  %353 = vmatpush3.msra.mxu1 %v162_v20 }
  0x39   :  { %319 = vmatprep.subr.mxu0 %v470_v0  ;;  %354 = vmatprep.subr.mxu1 %v470_v0 }
  0x3a   :  { %320 = vmatpush3.msra.mxu0 %v67_v17  ;;  %355 = vmatpush3.msra.mxu1 %v161_v22 }
  0x3b   :  { %321 = vmatprep.subr.mxu0 %v470_v0  ;;  %356 = vmatprep.subr.mxu1 %v470_v0 }
  0x3c   :  { %322 = vmatpush3.msra.mxu0 %v66_v19  ;;  %357 = vmatpush3.msra.mxu1 %v160_v24 }
  0x3d   :  { %323 = vmatprep.subr.mxu0 %v470_v0  ;;  %358 = vmatprep.subr.mxu1 %v470_v0 }
  0x3e   :  { %324 = vmatpush3.msra.mxu0 %v65_v21  ;;  %359 = vmatpush3.msra.mxu1 %v159_v26 }
  0x3f   :  { %325 = vmatprep.subr.mxu0 %v470_v0  ;;  %360 = vmatprep.subr.mxu1 %v470_v0 }
  0x40   :  { %326 = vmatpush3.msra.mxu0 %v64_v23  ;;  %361 = vmatpush3.msra.mxu1 %v158_v28 }
  0x41   :  { %327 = vmatprep.subr.mxu0 %v470_v0  ;;  %362 = vmatprep.subr.mxu1 %v470_v0 }
  0x42   :  { %328 = vmatpush3.msra.mxu0 %v63_v25  ;;  %363 = vmatpush3.msra.mxu1 %v157_v31 }
  0x43   :  { %329 = vmatprep.subr.mxu0 %v470_v0  ;;  %364 = vmatprep.subr.mxu1 %v470_v0 }
  0x44   :  { %330 = vmatpush3.msra.mxu0 %v62_v27  ;;  %365 = vmatpush3.msra.mxu1 %v156_v32 }
  0x45   :  { %331 = vmatprep.subr.mxu0 %v470_v0  ;;  %366 = vmatprep.subr.mxu1 %v470_v0 }
  0x46   :  { %332 = vmatpush3.msra.mxu0 %v61_v29  ;;  %367 = vmatpush3.msra.mxu1 %v155_v33 }
  0x47   :  { %334 = vmatmul.mubr.f32.vlgmr.msra.gmra.mxu0 %v60_v30 }
 0x107   :  { %v150_v35 = vpop.f32.mrf.mxu0 }
 0x108   :  { %v151_v36 = vadd.f32 %v265_v34, %v150_v35 }
 0x109   :  { %v335_v37 = vpop.f32.mrf.mxu0 }
 0x10a   :  { %v154_v38 = vmax.f32 %v151_v36, 0.0 }
 0x10c   :  { %369 = vmatmul.mubr.f32.vlgmr.msra.gmra.mxu1 %v154_v38 }
 0x1cc   :  { %v244_v40 = vpop.f32.mrf.mxu1 }
 0x1cd   :  { %v245_v41 = vadd.f32 %v266_v39, %v244_v40 }
 0x1ce   :  { %v370_v42 = vpop.f32.mrf.mxu1 }
 0x1cf   :  { %248 = vst [vmem:[#allocation8] sm:$0xff] %v245_v41 }
 0x1d0   :  { %450 = shalt.err (!%p447_p5)
}
 0x1d1   :  { %258 = dma.vmem_to_hbm [thread:$0]  %s256_s12, 128, %s560_s5, [#allocation4]  }
 0x1d2   :  { %463 = dma.done.wait [#allocation4], 128  }
 0x1d3   :  { %464 = vsyncadd [#allocation4], 4294967168 }
 0x1d4   :  { %262 = vsyncpa [#allocation3], 1 }
 0x1d5   :  { %263 = vsyncpa [#allocation6], 1 }
 0x1d6   :  { %264 = vsyncpa [#allocation4], 1 }

</bundles_post_ra>
